<compile_context>
chip_gen: v7x
topology: tpu7x:2x2x1
jax: 0.10.0
libtpu: 0.0.40
codegen_flags: <defaults>
</compile_context>

<pallas_src>
import functools
import math

import jax
import jax.numpy as jnp
from jax import lax
from jax.experimental import pallas as pl
from jax.experimental.pallas import tpu as pltpu


# ---------------------------------------------------------------------------
# Kernel 1: fused QKV projection over flattened (B*S) rows.
# ---------------------------------------------------------------------------
def qkv_proj_kernel(x_ref, w_ref, b_ref, q_ref, k_ref, v_ref):
    # x_ref: (TM, H) f32 ; w_ref: (H, 3H) bf16 (Q columns pre-scaled by 1/sqrt(D))
    # b_ref: (1, 3H) f32 ; q/k/v_ref: (TM, H) bf16
    h = q_ref.shape[-1]
    x = x_ref[...].astype(jnp.bfloat16)            # cast in-register; HBM read stays f32
    acc = jnp.dot(x, w_ref[...], preferred_element_type=jnp.float32)   # bf16 MXU
    acc = acc + b_ref[...]
    q_ref[...] = acc[:, :h].astype(q_ref.dtype)
    k_ref[...] = acc[:, h:2 * h].astype(k_ref.dtype)
    v_ref[...] = acc[:, 2 * h:].astype(v_ref.dtype)


# ---------------------------------------------------------------------------
# Kernel 2: attention for HG heads x TQ query rows per grid step.
# ---------------------------------------------------------------------------
def attention_kernel(q_ref, k_ref, v_ref, mask_ref, ctx_ref, probs_ref, *, head_dim):
    # q_ref:   (1, TQ, HG*D) bf16 (scale already folded in)
    # k/v_ref: (1, S,  HG*D) bf16
    # mask:    (1, 1, S) f32 additive mask
    # ctx_ref: (1, TQ, HG*D) f32  -- column slab of the merged (B, S, H) output
    # probs_ref: (1, HG, TQ, S) f32
    hg = probs_ref.shape[1]
    mask = mask_ref[0]                               # (1, S), broadcasts over rows
    q_all = q_ref[0]
    k_all = k_ref[0]
    v_all = v_ref[0]
    ctx_parts = []
    for g in range(hg):                              # static unroll over heads in group
        lo = g * head_dim
        q = lax.slice_in_dim(q_all, lo, lo + head_dim, axis=1)   # (TQ, D)
        k = lax.slice_in_dim(k_all, lo, lo + head_dim, axis=1)   # (S, D)
        v = lax.slice_in_dim(v_all, lo, lo + head_dim, axis=1)   # (S, D)
        # Q @ K^T without an in-kernel transpose: contract D of both operands.
        scores = lax.dot_general(q, k, (((1,), (1,)), ((), ())),
                                 preferred_element_type=jnp.float32)  # (TQ, S) f32
        scores = scores + mask
        m = jnp.max(scores, axis=-1, keepdims=True)
        e = jnp.exp(scores - m)
        denom = jnp.sum(e, axis=-1, keepdims=True)
        probs = e * pl.reciprocal(denom, approx=True)     # EUP reciprocal + VPU mul
        probs_ref[0, g] = probs.astype(probs_ref.dtype)
        # TODO(synk): nn.Dropout(attention_probs) omitted -- identity in eval mode;
        # training-mode dropout would use pltpu.prng_seed / pltpu.prng_random_bits.
        ctx_parts.append(jnp.dot(probs.astype(v.dtype), v,
                                 preferred_element_type=jnp.float32))  # (TQ, D)
    # Single lane-dense (TQ, HG*D) store into the merged output layout.
    ctx_ref[0] = jnp.concatenate(ctx_parts, axis=-1).astype(ctx_ref.dtype)


# ---------------------------------------------------------------------------
# Tiling heuristics (generation-aware via VMEM capacity query).
# ---------------------------------------------------------------------------
def _vmem_limit_bytes():
    try:
        cap = pltpu.get_tpu_info().vmem_capacity_bytes
    except Exception:
        cap = 64 * 1024 * 1024          # conservative (v7x-sized) fallback
    # 96 MiB on 128-MiB parts (v5e/v6e), 48 MiB on 64-MiB v7x.
    return int(min(cap * 3 // 4, 96 * 1024 * 1024))


def _pick_row_tile(m, h, budget):
    # Double-buffered per-row bytes: x f32 in + three bf16 outs.
    per_row = 2 * h * 4 + 2 * 3 * h * 2
    const = 2 * (h * 3 * h * 2) + 2 * 3 * h * 4     # bf16 fused weight (x2 buf) + bias
    avail = max(budget - const, per_row * 8)
    tm = int(min(m, 1024, avail // per_row))
    if tm < m:
        tm = max(8, (tm // 8) * 8)                  # sublane aligned; grid uses cdiv
    return tm


def _pick_q_tile(seq_len, max_tile=512):
    # Query-tile axis keeps the (TQ, S) probs block small enough for v7x VMEM.
    return seq_len if seq_len <= max_tile else max_tile   # cdiv grid masks the tail


def _pick_heads_per_step(num_heads, head_dim, seq_len, q_tile, budget):
    def fits(g):
        foot = 2 * (g * q_tile * seq_len * 4            # probs f32 block
                    + 3 * seq_len * g * head_dim * 2    # q/k/v bf16 blocks (upper bound)
                    + q_tile * g * head_dim * 4)        # ctx f32 block
        return foot <= budget
    if fits(num_heads):
        return num_heads                                # full-H blocks: always legal
    best = 1
    for g in range(1, num_heads):
        # Lane-dense (multiple-of-128) q/k/v/ctx slabs, largest that fits VMEM.
        if num_heads % g == 0 and (g * head_dim) % 128 == 0 and fits(g):
            best = g
    return best


# ---------------------------------------------------------------------------
# Parameter prep (done once, hoisted out of the forward pass).
# ---------------------------------------------------------------------------
def prepare_qkv_params(wq, bq, wk, bk, wv, bv, num_heads):
    """Fold 1/sqrt(D) into the Q projection and fuse Q/K/V into one (H, 3H)
    bf16 weight + (1, 3H) f32 bias. Weights are JAX layout (in, out) = W_torch.T."""
    h = wq.shape[0]
    d = h // num_heads
    scale = 1.0 / math.sqrt(d)
    w_qkv = jnp.concatenate([wq * scale, wk, wv], axis=1).astype(jnp.bfloat16)
    b_qkv = jnp.concatenate([bq * scale, bk, bv], axis=0).reshape(1, 3 * h)
    return w_qkv, b_qkv.astype(jnp.float32)


# ---------------------------------------------------------------------------
# Forward pass.
# ---------------------------------------------------------------------------
@functools.partial(jax.jit, static_argnums=(3,))
def bert_self_attention_forward(hidden_states, qkv_params, attention_mask, num_heads):
    """hidden_states: (B, S, H) f32; qkv_params from prepare_qkv_params;
    attention_mask: (B, S) additive mask (0 keep / -1e4 drop).
    Returns (context (B, S, H) f32, attention_probs (B, nH, S, S) f32)."""
    w_qkv, b_qkv = qkv_params
    B, S, H = hidden_states.shape
    D = H // num_heads
    M = B * S
    vmem_limit = _vmem_limit_bytes()

    # ---- Kernel 1: fused QKV projection over flattened rows ----------------
    x2d = hidden_states.reshape(M, H)
    TM = _pick_row_tile(M, H, vmem_limit // 2)
    out3 = jax.ShapeDtypeStruct((M, H), jnp.bfloat16)
    # TODO(synk): for very large H on v7x, additionally tile the 3H weight axis.
    q2d, k2d, v2d = pl.pallas_call(
        qkv_proj_kernel,
        out_shape=(out3, out3, out3),
        grid_spec=pltpu.PrefetchScalarGridSpec(
            num_scalar_prefetch=0,
            grid=(pl.cdiv(M, TM),),
            in_specs=[
                pl.BlockSpec((TM, H), lambda i: (i, 0)),        # x row tile
                pl.BlockSpec((H, 3 * H), lambda i: (0, 0)),     # fused QKV weight
                pl.BlockSpec((1, 3 * H), lambda i: (0, 0)),     # fused bias
            ],
            out_specs=[
                pl.BlockSpec((TM, H), lambda i: (i, 0)),
                pl.BlockSpec((TM, H), lambda i: (i, 0)),
                pl.BlockSpec((TM, H), lambda i: (i, 0)),
            ],
        ),
        compiler_params=pltpu.CompilerParams(
            dimension_semantics=("parallel",),
            vmem_limit_bytes=vmem_limit),
    )(x2d, w_qkv, b_qkv)

    # Free reshapes only -- no head split/merge transposes between the kernels.
    qh = q2d.reshape(B, S, H)
    kh = k2d.reshape(B, S, H)
    vh = v2d.reshape(B, S, H)
    mask3 = attention_mask.astype(jnp.float32).reshape(B, 1, S)

    # ---- Kernel 2: attention, HG heads x TQ query rows per grid step --------
    TQ = _pick_q_tile(S)
    HG = _pick_heads_per_step(num_heads, D, S, TQ, vmem_limit // 4)
    lanes = HG * D
    n_hg = num_heads // HG

    ctx, probs = pl.pallas_call(
        functools.partial(attention_kernel, head_dim=D),
        out_shape=(jax.ShapeDtypeStruct((B, S, H), jnp.float32),
                   jax.ShapeDtypeStruct((B, num_heads, S, S), jnp.float32)),
        grid_spec=pltpu.PrefetchScalarGridSpec(
            num_scalar_prefetch=0,
            grid=(B, n_hg, pl.cdiv(S, TQ)),
            in_specs=[
                pl.BlockSpec((1, TQ, lanes), lambda b, hg, qt: (b, qt, hg)),   # Q slab
                pl.BlockSpec((1, S, lanes), lambda b, hg, qt: (b, 0, hg)),     # K slab
                pl.BlockSpec((1, S, lanes), lambda b, hg, qt: (b, 0, hg)),     # V slab
                pl.BlockSpec((1, 1, S), lambda b, hg, qt: (b, 0, 0)),          # mask
            ],
            out_specs=[
                pl.BlockSpec((1, TQ, lanes), lambda b, hg, qt: (b, qt, hg)),   # merged ctx
                pl.BlockSpec((1, HG, TQ, S), lambda b, hg, qt: (b, hg, qt, 0)),
            ],
        ),
        compiler_params=pltpu.CompilerParams(
            dimension_semantics=("parallel", "parallel", "arbitrary"),
            vmem_limit_bytes=vmem_limit),
    )(qh, kh, vh, mask3)

    return ctx, probs


# ---------------------------------------------------------------------------
# Pure-JAX reference (mirrors the PyTorch module, f32 throughout).
# ---------------------------------------------------------------------------
def bert_self_attention_reference(hidden_states, wq, bq, wk, bk, wv, bv,
                                  attention_mask, num_heads):
    B, S, H = hidden_states.shape
    D = H // num_heads

    def proj(w, b):
        t = hidden_states @ w + b
        return t.reshape(B, S, num_heads, D).transpose(0, 2, 1, 3)

    q, k, v = proj(wq, bq), proj(wk, bk), proj(wv, bv)
    scores = jnp.einsum("bhqd,bhkd->bhqk", q, k) / math.sqrt(D)
    scores = scores + attention_mask[:, None, None, :]
    probs = jax.nn.softmax(scores, axis=-1)
    ctx = jnp.einsum("bhqk,bhkd->bhqd", probs, v)
    ctx = ctx.transpose(0, 2, 1, 3).reshape(B, S, H)
    return ctx, probs


if __name__ == "__main__":
    # Small shapes consistent with the module: batch=2, seq=8, hidden=32, heads=4.
    B, S, H, NH = 2, 8, 32, 4
    key = jax.random.PRNGKey(0)
    kx, kq, kk, kv, kbq, kbk, kbv, km = jax.random.split(key, 8)

    x = jax.random.normal(kx, (B, S, H), dtype=jnp.float32)
    bound = 1.0 / math.sqrt(H)

    def init(k, shape):
        return jax.random.uniform(k, shape, minval=-bound, maxval=bound,
                                  dtype=jnp.float32)

    wq, wk, wv = init(kq, (H, H)), init(kk, (H, H)), init(kv, (H, H))
    bq, bk, bv = init(kbq, (H,)), init(kbk, (H,)), init(kbv, (H,))

    # Additive attention mask: 0 for attended positions, -10000 for masked.
    keep = (jax.random.uniform(km, (B, S)) > 0.2).astype(jnp.float32)
    attention_mask = (1.0 - keep) * -10000.0

    params = prepare_qkv_params(wq, bq, wk, bk, wv, bv, NH)  # one-time prep
    ctx, probs = bert_self_attention_forward(x, params, attention_mask, NH)
    ctx = jax.block_until_ready(ctx)
    probs = jax.block_until_ready(probs)

    ref_ctx, ref_probs = bert_self_attention_reference(
        x, wq, bq, wk, bk, wv, bv, attention_mask, NH)

    assert ctx.shape == (B, S, H)
    assert probs.shape == (B, NH, S, S)
    # bf16 MXU operands + approx reciprocal => relaxed tolerance vs f32 reference.
    assert jnp.allclose(ctx, ref_ctx, atol=5e-2, rtol=5e-2), "context mismatch"
    assert jnp.allclose(probs, ref_probs, atol=5e-2, rtol=5e-2), "probs mismatch"

    print("KERNEL_OK")
</pallas_src>

<mosaic_0001>
module attributes {stable_mosaic.version = 11 : i64} {
  func.func @qkv_proj_kernel(%arg0: i32, %arg1: memref<16x32xf32, #tpu.memory_space<vmem>>, %arg2: memref<32x96xbf16, #tpu.memory_space<vmem>>, %arg3: memref<1x96xf32, #tpu.memory_space<vmem>>, %arg4: memref<16x32xbf16, #tpu.memory_space<vmem>>, %arg5: memref<16x32xbf16, #tpu.memory_space<vmem>>, %arg6: memref<16x32xbf16, #tpu.memory_space<vmem>>) attributes {dimension_semantics = [#tpu.dimension_semantics<parallel>], iteration_bounds = array<i64: 1>, scalar_prefetch = 0 : i64, scratch_operands = 0 : i64, tpu.core_type = #tpu.core_type<tc>, window_params = [{transform_indices = @transform_0, window_bounds = array<i64: 16, 32>}, {pipeline_mode = #tpu.pipeline_mode<synchronous>, transform_indices = @transform_1, window_bounds = array<i64: 32, 96>}, {pipeline_mode = #tpu.pipeline_mode<synchronous>, transform_indices = @transform_2, window_bounds = array<i64: 1, 96>}, {transform_indices = @transform_3, window_bounds = array<i64: 16, 32>}, {transform_indices = @transform_4, window_bounds = array<i64: 16, 32>}, {transform_indices = @transform_5, window_bounds = array<i64: 16, 32>}]} {
    %c0 = arith.constant 0 : index
    %c0_0 = arith.constant 0 : index
    %0 = vector.load %arg1[%c0, %c0_0] : memref<16x32xf32, #tpu.memory_space<vmem>>, vector<16x32xf32>
    %1 = arith.truncf %0 : vector<16x32xf32> to vector<16x32xbf16>
    %c0_1 = arith.constant 0 : index
    %c0_2 = arith.constant 0 : index
    %2 = vector.load %arg2[%c0_1, %c0_2] : memref<32x96xbf16, #tpu.memory_space<vmem>>, vector<32x96xbf16>
    %cst = arith.constant dense<0.000000e+00> : vector<16x96xf32>
    %3 = tpu.matmul %1, %2, %cst {dimension_numbers = #tpu.dot_dimension_numbers<[1], [0], [0], [1], [0, 0, 1, 1], [], []>} : vector<16x32xbf16>, vector<32x96xbf16>, vector<16x96xf32> -> vector<16x96xf32>
    %c0_3 = arith.constant 0 : index
    %c0_4 = arith.constant 0 : index
    %4 = vector.load %arg3[%c0_3, %c0_4] : memref<1x96xf32, #tpu.memory_space<vmem>>, vector<1x96xf32>
    %5 = vector.broadcast %4 : vector<1x96xf32> to vector<16x96xf32>
    %6 = arith.addf %3, %5 : vector<16x96xf32>
    %7 = vector.extract_strided_slice %6 {offsets = [0, 0], sizes = [16, 32], strides = [1, 1]} : vector<16x96xf32> to vector<16x32xf32>
    %8 = arith.truncf %7 : vector<16x32xf32> to vector<16x32xbf16>
    %c0_5 = arith.constant 0 : index
    %c0_6 = arith.constant 0 : index
    %9 = vector.load %arg4[%c0_5, %c0_6] : memref<16x32xbf16, #tpu.memory_space<vmem>>, vector<16x32xbf16>
    tpu.vector_store %arg4[%c0_5, %c0_6], %8 {strides = array<i32>} : memref<16x32xbf16, #tpu.memory_space<vmem>>, vector<16x32xbf16>,
    %10 = vector.extract_strided_slice %6 {offsets = [0, 32], sizes = [16, 32], strides = [1, 1]} : vector<16x96xf32> to vector<16x32xf32>
    %11 = arith.truncf %10 : vector<16x32xf32> to vector<16x32xbf16>
    %c0_7 = arith.constant 0 : index
    %c0_8 = arith.constant 0 : index
    %12 = vector.load %arg5[%c0_7, %c0_8] : memref<16x32xbf16, #tpu.memory_space<vmem>>, vector<16x32xbf16>
    tpu.vector_store %arg5[%c0_7, %c0_8], %11 {strides = array<i32>} : memref<16x32xbf16, #tpu.memory_space<vmem>>, vector<16x32xbf16>,
    %13 = vector.extract_strided_slice %6 {offsets = [0, 64], sizes = [16, 32], strides = [1, 1]} : vector<16x96xf32> to vector<16x32xf32>
    %14 = arith.truncf %13 : vector<16x32xf32> to vector<16x32xbf16>
    %c0_9 = arith.constant 0 : index
    %c0_10 = arith.constant 0 : index
    %15 = vector.load %arg6[%c0_9, %c0_10] : memref<16x32xbf16, #tpu.memory_space<vmem>>, vector<16x32xbf16>
    tpu.vector_store %arg6[%c0_9, %c0_10], %14 {strides = array<i32>} : memref<16x32xbf16, #tpu.memory_space<vmem>>, vector<16x32xbf16>,
    return
  }
  func.func @transform_0(%arg0: i32) -> (i32, i32) {
    %c0_i32 = arith.constant 0 : i32
    %c0_i32_0 = arith.constant 0 : i32
    return %arg0, %c0_i32 : i32, i32
  }
  func.func @transform_1(%arg0: i32) -> (i32, i32) {
    %c0_i32 = arith.constant 0 : i32
    %c0_i32_0 = arith.constant 0 : i32
    %c0_i32_1 = arith.constant 0 : i32
    return %c0_i32, %c0_i32_0 : i32, i32
  }
  func.func @transform_2(%arg0: i32) -> (i32, i32) {
    %c0_i32 = arith.constant 0 : i32
    %c0_i32_0 = arith.constant 0 : i32
    %c0_i32_1 = arith.constant 0 : i32
    return %c0_i32, %c0_i32_0 : i32, i32
  }
  func.func @transform_3(%arg0: i32) -> (i32, i32) {
    %c0_i32 = arith.constant 0 : i32
    %c0_i32_0 = arith.constant 0 : i32
    return %arg0, %c0_i32 : i32, i32
  }
  func.func @transform_4(%arg0: i32) -> (i32, i32) {
    %c0_i32 = arith.constant 0 : i32
    %c0_i32_0 = arith.constant 0 : i32
    return %arg0, %c0_i32 : i32, i32
  }
  func.func @transform_5(%arg0: i32) -> (i32, i32) {
    %c0_i32 = arith.constant 0 : i32
    %c0_i32_0 = arith.constant 0 : i32
    return %arg0, %c0_i32 : i32, i32
  }
}

module attributes {stable_mosaic.version = 11 : i64} {
  func.func @attention_kernel(%arg0: i32, %arg1: i32, %arg2: i32, %arg3: memref<1x8x32xbf16, #tpu.memory_space<vmem>>, %arg4: memref<1x8x32xbf16, #tpu.memory_space<vmem>>, %arg5: memref<1x8x32xbf16, #tpu.memory_space<vmem>>, %arg6: memref<1x1x8xf32, #tpu.memory_space<vmem>>, %arg7: memref<1x8x32xf32, #tpu.memory_space<vmem>>, %arg8: memref<1x4x8x8xf32, #tpu.memory_space<vmem>>) attributes {dimension_semantics = [#tpu.dimension_semantics<parallel>, #tpu.dimension_semantics<parallel>, #tpu.dimension_semantics<arbitrary>], iteration_bounds = array<i64: 2, 1, 1>, scalar_prefetch = 0 : i64, scratch_operands = 0 : i64, tpu.core_type = #tpu.core_type<tc>, window_params = [{transform_indices = @transform_0, window_bounds = array<i64: 1, 8, 32>}, {transform_indices = @transform_1, window_bounds = array<i64: 1, 8, 32>}, {transform_indices = @transform_2, window_bounds = array<i64: 1, 8, 32>}, {transform_indices = @transform_3, window_bounds = array<i64: 1, 1, 8>}, {transform_indices = @transform_4, window_bounds = array<i64: 1, 8, 32>}, {transform_indices = @transform_5, window_bounds = array<i64: 1, 4, 8, 8>}]} {
    %c0 = arith.constant 0 : index
    %c0_0 = arith.constant 0 : index
    %c0_1 = arith.constant 0 : index
    %0 = vector.load %arg6[%c0, %c0_0, %c0_1] : memref<1x1x8xf32, #tpu.memory_space<vmem>>, vector<1x1x8xf32>
    %1 = vector.shape_cast %0 : vector<1x1x8xf32> to vector<1x8xf32>
    %c0_2 = arith.constant 0 : index
    %c0_3 = arith.constant 0 : index
    %c0_4 = arith.constant 0 : index
    %2 = vector.load %arg3[%c0_2, %c0_3, %c0_4] : memref<1x8x32xbf16, #tpu.memory_space<vmem>>, vector<1x8x32xbf16>
    %3 = vector.shape_cast %2 : vector<1x8x32xbf16> to vector<8x32xbf16>
    %c0_5 = arith.constant 0 : index
    %c0_6 = arith.constant 0 : index
    %c0_7 = arith.constant 0 : index
    %4 = vector.load %arg4[%c0_5, %c0_6, %c0_7] : memref<1x8x32xbf16, #tpu.memory_space<vmem>>, vector<1x8x32xbf16>
    %5 = vector.shape_cast %4 : vector<1x8x32xbf16> to vector<8x32xbf16>
    %c0_8 = arith.constant 0 : index
    %c0_9 = arith.constant 0 : index
    %c0_10 = arith.constant 0 : index
    %6 = vector.load %arg5[%c0_8, %c0_9, %c0_10] : memref<1x8x32xbf16, #tpu.memory_space<vmem>>, vector<1x8x32xbf16>
    %7 = vector.shape_cast %6 : vector<1x8x32xbf16> to vector<8x32xbf16>
    %8 = vector.extract_strided_slice %3 {offsets = [0, 0], sizes = [8, 8], strides = [1, 1]} : vector<8x32xbf16> to vector<8x8xbf16>
    %9 = vector.extract_strided_slice %5 {offsets = [0, 0], sizes = [8, 8], strides = [1, 1]} : vector<8x32xbf16> to vector<8x8xbf16>
    %10 = vector.extract_strided_slice %7 {offsets = [0, 0], sizes = [8, 8], strides = [1, 1]} : vector<8x32xbf16> to vector<8x8xbf16>
    %cst = arith.constant dense<0.000000e+00> : vector<8x8xf32>
    %11 = tpu.matmul %8, %9, %cst {dimension_numbers = #tpu.dot_dimension_numbers<[1], [1], [0], [0], [0, 0, 1, 0], [], []>} : vector<8x8xbf16>, vector<8x8xbf16>, vector<8x8xf32> -> vector<8x8xf32>
    %12 = vector.broadcast %1 : vector<1x8xf32> to vector<8x8xf32>
    %13 = arith.addf %11, %12 : vector<8x8xf32>
    %cst_11 = arith.constant dense<0xFF800000> : vector<8xf32>
    %14 = vector.multi_reduction <maximumf>, %13, %cst_11 [1] : vector<8x8xf32> to vector<8xf32>
    %15 = vector.shape_cast %14 : vector<8xf32> to vector<8x1xf32>
    %16 = vector.broadcast %15 : vector<8x1xf32> to vector<8x8xf32>
    %17 = arith.subf %13, %16 : vector<8x8xf32>
    %18 = math.exp %17 : vector<8x8xf32>
    %cst_12 = arith.constant dense<0.000000e+00> : vector<8xf32>
    %19 = vector.multi_reduction <add>, %18, %cst_12 [1] : vector<8x8xf32> to vector<8xf32>
    %20 = vector.shape_cast %19 : vector<8xf32> to vector<8x1xf32>
    %21 = tpu.reciprocal %20 {approx = true} : vector<8x1xf32> -> vector<8x1xf32>
    %22 = vector.broadcast %21 : vector<8x1xf32> to vector<8x8xf32>
    %23 = arith.mulf %18, %22 : vector<8x8xf32>
    %c0_13 = arith.constant 0 : index
    %c0_14 = arith.constant 0 : index
    %c0_15 = arith.constant 0 : index
    %c0_16 = arith.constant 0 : index
    %24 = vector.load %arg8[%c0_13, %c0_14, %c0_15, %c0_16] : memref<1x4x8x8xf32, #tpu.memory_space<vmem>>, vector<1x1x8x8xf32>
    %25 = vector.shape_cast %24 : vector<1x1x8x8xf32> to vector<8x8xf32>
    %26 = vector.shape_cast %23 : vector<8x8xf32> to vector<1x1x8x8xf32>
    tpu.vector_store %arg8[%c0_13, %c0_14, %c0_15, %c0_16], %26 {strides = array<i32>} : memref<1x4x8x8xf32, #tpu.memory_space<vmem>>, vector<1x1x8x8xf32>,
    %27 = arith.truncf %23 : vector<8x8xf32> to vector<8x8xbf16>
    %cst_17 = arith.constant dense<0.000000e+00> : vector<8x8xf32>
    %28 = tpu.matmul %27, %10, %cst_17 {dimension_numbers = #tpu.dot_dimension_numbers<[1], [0], [0], [1], [0, 0, 1, 1], [], []>} : vector<8x8xbf16>, vector<8x8xbf16>, vector<8x8xf32> -> vector<8x8xf32>
    %29 = vector.extract_strided_slice %3 {offsets = [0, 8], sizes = [8, 8], strides = [1, 1]} : vector<8x32xbf16> to vector<8x8xbf16>
    %30 = vector.extract_strided_slice %5 {offsets = [0, 8], sizes = [8, 8], strides = [1, 1]} : vector<8x32xbf16> to vector<8x8xbf16>
    %31 = vector.extract_strided_slice %7 {offsets = [0, 8], sizes = [8, 8], strides = [1, 1]} : vector<8x32xbf16> to vector<8x8xbf16>
    %cst_18 = arith.constant dense<0.000000e+00> : vector<8x8xf32>
    %32 = tpu.matmul %29, %30, %cst_18 {dimension_numbers = #tpu.dot_dimension_numbers<[1], [1], [0], [0], [0, 0, 1, 0], [], []>} : vector<8x8xbf16>, vector<8x8xbf16>, vector<8x8xf32> -> vector<8x8xf32>
    %33 = vector.broadcast %1 : vector<1x8xf32> to vector<8x8xf32>
    %34 = arith.addf %32, %33 : vector<8x8xf32>
    %cst_19 = arith.constant dense<0xFF800000> : vector<8xf32>
    %35 = vector.multi_reduction <maximumf>, %34, %cst_19 [1] : vector<8x8xf32> to vector<8xf32>
    %36 = vector.shape_cast %35 : vector<8xf32> to vector<8x1xf32>
    %37 = vector.broadcast %36 : vector<8x1xf32> to vector<8x8xf32>
    %38 = arith.subf %34, %37 : vector<8x8xf32>
    %39 = math.exp %38 : vector<8x8xf32>
    %cst_20 = arith.constant dense<0.000000e+00> : vector<8xf32>
    %40 = vector.multi_reduction <add>, %39, %cst_20 [1] : vector<8x8xf32> to vector<8xf32>
    %41 = vector.shape_cast %40 : vector<8xf32> to vector<8x1xf32>
    %42 = tpu.reciprocal %41 {approx = true} : vector<8x1xf32> -> vector<8x1xf32>
    %43 = vector.broadcast %42 : vector<8x1xf32> to vector<8x8xf32>
    %44 = arith.mulf %39, %43 : vector<8x8xf32>
    %c0_21 = arith.constant 0 : index
    %c1 = arith.constant 1 : index
    %c0_22 = arith.constant 0 : index
    %c0_23 = arith.constant 0 : index
    %45 = vector.load %arg8[%c0_21, %c1, %c0_22, %c0_23] : memref<1x4x8x8xf32, #tpu.memory_space<vmem>>, vector<1x1x8x8xf32>
    %46 = vector.shape_cast %45 : vector<1x1x8x8xf32> to vector<8x8xf32>
    %47 = vector.shape_cast %44 : vector<8x8xf32> to vector<1x1x8x8xf32>
    tpu.vector_store %arg8[%c0_21, %c1, %c0_22, %c0_23], %47 {strides = array<i32>} : memref<1x4x8x8xf32, #tpu.memory_space<vmem>>, vector<1x1x8x8xf32>,
    %48 = arith.truncf %44 : vector<8x8xf32> to vector<8x8xbf16>
    %cst_24 = arith.constant dense<0.000000e+00> : vector<8x8xf32>
    %49 = tpu.matmul %48, %31, %cst_24 {dimension_numbers = #tpu.dot_dimension_numbers<[1], [0], [0], [1], [0, 0, 1, 1], [], []>} : vector<8x8xbf16>, vector<8x8xbf16>, vector<8x8xf32> -> vector<8x8xf32>
    %50 = vector.extract_strided_slice %3 {offsets = [0, 16], sizes = [8, 8], strides = [1, 1]} : vector<8x32xbf16> to vector<8x8xbf16>
    %51 = vector.extract_strided_slice %5 {offsets = [0, 16], sizes = [8, 8], strides = [1, 1]} : vector<8x32xbf16> to vector<8x8xbf16>
    %52 = vector.extract_strided_slice %7 {offsets = [0, 16], sizes = [8, 8], strides = [1, 1]} : vector<8x32xbf16> to vector<8x8xbf16>
    %cst_25 = arith.constant dense<0.000000e+00> : vector<8x8xf32>
    %53 = tpu.matmul %50, %51, %cst_25 {dimension_numbers = #tpu.dot_dimension_numbers<[1], [1], [0], [0], [0, 0, 1, 0], [], []>} : vector<8x8xbf16>, vector<8x8xbf16>, vector<8x8xf32> -> vector<8x8xf32>
    %54 = vector.broadcast %1 : vector<1x8xf32> to vector<8x8xf32>
    %55 = arith.addf %53, %54 : vector<8x8xf32>
    %cst_26 = arith.constant dense<0xFF800000> : vector<8xf32>
    %56 = vector.multi_reduction <maximumf>, %55, %cst_26 [1] : vector<8x8xf32> to vector<8xf32>
    %57 = vector.shape_cast %56 : vector<8xf32> to vector<8x1xf32>
    %58 = vector.broadcast %57 : vector<8x1xf32> to vector<8x8xf32>
    %59 = arith.subf %55, %58 : vector<8x8xf32>
    %60 = math.exp %59 : vector<8x8xf32>
    %cst_27 = arith.constant dense<0.000000e+00> : vector<8xf32>
    %61 = vector.multi_reduction <add>, %60, %cst_27 [1] : vector<8x8xf32> to vector<8xf32>
    %62 = vector.shape_cast %61 : vector<8xf32> to vector<8x1xf32>
    %63 = tpu.reciprocal %62 {approx = true} : vector<8x1xf32> -> vector<8x1xf32>
    %64 = vector.broadcast %63 : vector<8x1xf32> to vector<8x8xf32>
    %65 = arith.mulf %60, %64 : vector<8x8xf32>
    %c0_28 = arith.constant 0 : index
    %c2 = arith.constant 2 : index
    %c0_29 = arith.constant 0 : index
    %c0_30 = arith.constant 0 : index
    %66 = vector.load %arg8[%c0_28, %c2, %c0_29, %c0_30] : memref<1x4x8x8xf32, #tpu.memory_space<vmem>>, vector<1x1x8x8xf32>
    %67 = vector.shape_cast %66 : vector<1x1x8x8xf32> to vector<8x8xf32>
    %68 = vector.shape_cast %65 : vector<8x8xf32> to vector<1x1x8x8xf32>
    tpu.vector_store %arg8[%c0_28, %c2, %c0_29, %c0_30], %68 {strides = array<i32>} : memref<1x4x8x8xf32, #tpu.memory_space<vmem>>, vector<1x1x8x8xf32>,
    %69 = arith.truncf %65 : vector<8x8xf32> to vector<8x8xbf16>
    %cst_31 = arith.constant dense<0.000000e+00> : vector<8x8xf32>
    %70 = tpu.matmul %69, %52, %cst_31 {dimension_numbers = #tpu.dot_dimension_numbers<[1], [0], [0], [1], [0, 0, 1, 1], [], []>} : vector<8x8xbf16>, vector<8x8xbf16>, vector<8x8xf32> -> vector<8x8xf32>
    %71 = vector.extract_strided_slice %3 {offsets = [0, 24], sizes = [8, 8], strides = [1, 1]} : vector<8x32xbf16> to vector<8x8xbf16>
    %72 = vector.extract_strided_slice %5 {offsets = [0, 24], sizes = [8, 8], strides = [1, 1]} : vector<8x32xbf16> to vector<8x8xbf16>
    %73 = vector.extract_strided_slice %7 {offsets = [0, 24], sizes = [8, 8], strides = [1, 1]} : vector<8x32xbf16> to vector<8x8xbf16>
    %cst_32 = arith.constant dense<0.000000e+00> : vector<8x8xf32>
    %74 = tpu.matmul %71, %72, %cst_32 {dimension_numbers = #tpu.dot_dimension_numbers<[1], [1], [0], [0], [0, 0, 1, 0], [], []>} : vector<8x8xbf16>, vector<8x8xbf16>, vector<8x8xf32> -> vector<8x8xf32>
    %75 = vector.broadcast %1 : vector<1x8xf32> to vector<8x8xf32>
    %76 = arith.addf %74, %75 : vector<8x8xf32>
    %cst_33 = arith.constant dense<0xFF800000> : vector<8xf32>
    %77 = vector.multi_reduction <maximumf>, %76, %cst_33 [1] : vector<8x8xf32> to vector<8xf32>
    %78 = vector.shape_cast %77 : vector<8xf32> to vector<8x1xf32>
    %79 = vector.broadcast %78 : vector<8x1xf32> to vector<8x8xf32>
    %80 = arith.subf %76, %79 : vector<8x8xf32>
    %81 = math.exp %80 : vector<8x8xf32>
    %cst_34 = arith.constant dense<0.000000e+00> : vector<8xf32>
    %82 = vector.multi_reduction <add>, %81, %cst_34 [1] : vector<8x8xf32> to vector<8xf32>
    %83 = vector.shape_cast %82 : vector<8xf32> to vector<8x1xf32>
    %84 = tpu.reciprocal %83 {approx = true} : vector<8x1xf32> -> vector<8x1xf32>
    %85 = vector.broadcast %84 : vector<8x1xf32> to vector<8x8xf32>
    %86 = arith.mulf %81, %85 : vector<8x8xf32>
    %c0_35 = arith.constant 0 : index
    %c3 = arith.constant 3 : index
    %c0_36 = arith.constant 0 : index
    %c0_37 = arith.constant 0 : index
    %87 = vector.load %arg8[%c0_35, %c3, %c0_36, %c0_37] : memref<1x4x8x8xf32, #tpu.memory_space<vmem>>, vector<1x1x8x8xf32>
    %88 = vector.shape_cast %87 : vector<1x1x8x8xf32> to vector<8x8xf32>
    %89 = vector.shape_cast %86 : vector<8x8xf32> to vector<1x1x8x8xf32>
    tpu.vector_store %arg8[%c0_35, %c3, %c0_36, %c0_37], %89 {strides = array<i32>} : memref<1x4x8x8xf32, #tpu.memory_space<vmem>>, vector<1x1x8x8xf32>,
    %90 = arith.truncf %86 : vector<8x8xf32> to vector<8x8xbf16>
    %cst_38 = arith.constant dense<0.000000e+00> : vector<8x8xf32>
    %91 = tpu.matmul %90, %73, %cst_38 {dimension_numbers = #tpu.dot_dimension_numbers<[1], [0], [0], [1], [0, 0, 1, 1], [], []>} : vector<8x8xbf16>, vector<8x8xbf16>, vector<8x8xf32> -> vector<8x8xf32>
    %92 = tpu.concatenate %28, %49, %70, %91 in 1 : vector<8x8xf32>, vector<8x8xf32>, vector<8x8xf32>, vector<8x8xf32> -> vector<8x32xf32>
    %c0_39 = arith.constant 0 : index
    %c0_40 = arith.constant 0 : index
    %c0_41 = arith.constant 0 : index
    %93 = vector.load %arg7[%c0_39, %c0_40, %c0_41] : memref<1x8x32xf32, #tpu.memory_space<vmem>>, vector<1x8x32xf32>
    %94 = vector.shape_cast %93 : vector<1x8x32xf32> to vector<8x32xf32>
    %95 = vector.shape_cast %92 : vector<8x32xf32> to vector<1x8x32xf32>
    tpu.vector_store %arg7[%c0_39, %c0_40, %c0_41], %95 {strides = array<i32>} : memref<1x8x32xf32, #tpu.memory_space<vmem>>, vector<1x8x32xf32>,
    return
  }
  func.func @transform_0(%arg0: i32, %arg1: i32, %arg2: i32) -> (i32, i32, i32) {
    %c0_i32 = arith.constant 0 : i32
    return %arg0, %arg2, %arg1 : i32, i32, i32
  }
  func.func @transform_1(%arg0: i32, %arg1: i32, %arg2: i32) -> (i32, i32, i32) {
    %c0_i32 = arith.constant 0 : i32
    %c0_i32_0 = arith.constant 0 : i32
    return %arg0, %c0_i32, %arg1 : i32, i32, i32
  }
  func.func @transform_2(%arg0: i32, %arg1: i32, %arg2: i32) -> (i32, i32, i32) {
    %c0_i32 = arith.constant 0 : i32
    %c0_i32_0 = arith.constant 0 : i32
    return %arg0, %c0_i32, %arg1 : i32, i32, i32
  }
  func.func @transform_3(%arg0: i32, %arg1: i32, %arg2: i32) -> (i32, i32, i32) {
    %c0_i32 = arith.constant 0 : i32
    %c0_i32_0 = arith.constant 0 : i32
    %c0_i32_1 = arith.constant 0 : i32
    return %arg0, %c0_i32, %c0_i32_0 : i32, i32, i32
  }
  func.func @transform_4(%arg0: i32, %arg1: i32, %arg2: i32) -> (i32, i32, i32) {
    %c0_i32 = arith.constant 0 : i32
    return %arg0, %arg2, %arg1 : i32, i32, i32
  }
  func.func @transform_5(%arg0: i32, %arg1: i32, %arg2: i32) -> (i32, i32, i32, i32) {
    %c0_i32 = arith.constant 0 : i32
    %c0_i32_0 = arith.constant 0 : i32
    return %arg0, %arg1, %arg2, %c0_i32 : i32, i32, i32, i32
  }
}

</mosaic_0001>

<bundles_post_ra>
// kernel: bert_self_attention_forward.2
= control target key start
LH: loop header
LB: loop body
LE: loop exit
PB: predicated region body
PF: predicated region fallthrough
CT: control target
= control target key end

     0   :  { %11 = vsyncpa [#allocation3], 0  ;;  %s330_s0 = inlined_call_operand.hbm [shape: f32[16,32], index: 0, kind: input, shape index: {}]   ;;  %s331_s1 = inlined_call_operand.hbm [shape: bf16[32,96], index: 1, kind: input, shape index: {}]   ;;  %s332_s2 = inlined_call_operand.vmem [shape: f32[1,96], index: 2, kind: input, shape index: {}]   ;;  %s333_s3 = inlined_call_operand.vmem [shape: bf16[16,32], index: 3, kind: output, shape index: {0}]   ;;  %s334_s4 = inlined_call_operand.vmem [shape: bf16[16,32], index: 4, kind: output, shape index: {1}]   ;;  %s335_s5 = inlined_call_operand.vmem [shape: bf16[16,32], index: 5, kind: output, shape index: {2}]  }
   0x1   :  { %12 = vsyncpa [#allocation5], 0  ;;  %s236_s18 = smov [#allocation2]   ;;  %s188_s22 = scalar_lea.hbm %s330_s0, 256 }
   0x2   :  { %s18_s19 = sshll.u32 %s236_s18, 4  ;;  %p189_p0 = scmp.ne.s32.totalorder %s330_s0, %s188_s22  ;;  %s19_s19 = int_to_ptr.vmem [resolvable:$true] %s18_s19 }
   0x3   :  { %p192_p1 = scmp.lt.u32.totalorder %s188_s22, %s330_s0 }
   0x5   :  { %p194_p2 = pnand %p192_p1, %p189_p0 }
   0x7   :  { %197 = shalt.err (!%p194_p2)
}
   0x8   :  { %s198_s27 = scalar_lea.vmem %s19_s19, 256  ;;  %p203_p4 = scmp.lt.s32.totalorder %s19_s19, %s19_s19 }
   0x9   :  { %p199_p3 = scmp.ne.s32.totalorder %s19_s19, %s198_s27  ;;  %p204_p5 = scmp.lt.s32.totalorder %s198_s27, %s198_s27 }
   0xb   :  { %p205_p6 = por %p204_p5, %p203_p4 }
   0xd   :  { %p206_p7 = pnand %p205_p6, %p199_p3 }
   0xf   :  { %209 = shalt.err (!%p206_p7)
}
  0x10   :  { %s237_s28 = smov 128   ;;  %s238_s29 = smov 8  }
  0x11   :  { %24 = dma.hbm_to_vmem [thread:$0]  %s330_s0, 256, %s19_s19, [#allocation3], %s237_s28, %s237_s28, %s238_s29  }
  0x12   :  { %s239_s7 = smov [#allocation4]   ;;  %s210_s11 = scalar_lea.hbm %s331_s1, 256 }
  0x13   :  { %s30_s8 = sshll.u32 %s239_s7, 4  ;;  %p211_p8 = scmp.ne.s32.totalorder %s331_s1, %s210_s11  ;;  %s31_s8 = int_to_ptr.vmem [resolvable:$true] %s30_s8 }
  0x14   :  { %p214_p9 = scmp.lt.u32.totalorder %s210_s11, %s331_s1 }
  0x16   :  { %p216_p10 = pnand %p214_p9, %p211_p8 }
  0x18   :  { %219 = shalt.err (!%p216_p10)
}
  0x19   :  { %s220_s16 = scalar_lea.vmem %s31_s8, 256  ;;  %p225_p12 = scmp.lt.s32.totalorder %s31_s8, %s31_s8 }
  0x1a   :  { %p221_p11 = scmp.ne.s32.totalorder %s31_s8, %s220_s16  ;;  %p226_p13 = scmp.lt.s32.totalorder %s220_s16, %s220_s16 }
  0x1c   :  { %p227_p0 = por %p226_p13, %p225_p12 }
  0x1e   :  { %p228_p1 = pnand %p227_p0, %p221_p11 }
  0x20   :  { %231 = shalt.err (!%p228_p1)
}
  0x21   :  { %s240_s0 = smov 64   ;;  %s241_s17 = smov 4  }
  0x22   :  { %36 = dma.hbm_to_vmem [thread:$0]  %s331_s1, 256, %s31_s8, [#allocation5], %s240_s0, %s240_s0, %s241_s17  }
  0x23   :  { %232 = dma.done.wait [#allocation3], 256  }
  0x24   :  { %233 = vsyncadd [#allocation3], 4294967040 }
  0x25   :  { %234 = dma.done.wait [#allocation5], 256  }
  0x26   :  { %235 = vsyncadd [#allocation5], 4294967040  ;;  %v242_v0 = vmov 0.0   ;;  %vm243_vm0 = vmmov 0   ;;  %v186_v1 = vld [vmem:[#allocation4] sm:$0xff]   ;;  %v187_v2 = vld [vmem:[#allocation4 + $0x8] sm:$0xff]  }
  0x27   :  { %169 = vmatprep.subr.bf16.mxu0 %v242_v0  ;;  %173 = vmatprep.mubr.msk.bf16.mxu0 %vm243_vm0, %v242_v0  ;;  %v46_v3 = vld [vmem:[#allocation2] sm:$0xff]  ;;  %v47_v4 = vld [vmem:[#allocation2 + $0x8] sm:$0xff]  ;;  %vm72_vm1 = vcmask 261120   ;;  %vm125_vm2 = vcmask 257024   ;;  %s244_s23 = smov 96  }
  0x28   :  { %170 = vmatpush3.bf16.msra.mxu0 %v186_v1  ;;  %v48_v5 = vpack.c.bf16 %v47_v4, %v46_v3  ;;  %v158_v6 = vld [vmem:[%s332_s2] ss:$0 sm:$0xff] }
  0x29   :  { %171 = vmatprep.subr.bf16.mxu0 %v242_v0 }
  0x2c   :  { %172 = vmatpush3.bf16.msra.mxu0 %v187_v2 }
  0x2f   :  { %174 = vmatmul.mubr.msk.bf16.vlgmr.msra.gmra.mrb[0].mxu0 %vm72_vm1, %v48_v5 }
 0x102   :  { %v110_v7 = vpop.f32.mrb[0].mxu0 }
 0x103   :  { %v111_v8 = vadd.f32 %v158_v6, %v110_v7  ;;  %v175_v9 = vpop.f32.mrb[1].mxu0 }
 0x104   :  { %v113_v10 = vpop.f32.mrb[2].mxu0 }
 0x105   :  { %v164_v11 = vpack.c.bf16 %v111_v8, %v111_v8  ;;  %v114_v12 = vadd.f32 %v158_v6, %v113_v10  ;;  %v176_v13 = vpop.f32.mrb[3].mxu0 }
 0x107   :  { %126 = vst.msk [vmem:[%s333_s3] sm:$0xf] %vm125_vm2, %v164_v11  ;;  %v165_v14 = vpack.c.bf16 %v114_v12, %v114_v12  ;;  %136 = vrot.lane.b32.xlu1 %v164_v11, %s240_s0  ;;  %128 = vrot.lane.b32.xlu0 %v164_v11, %s244_s23 }
 0x109   :  { %127 = vst.msk [vmem:[%s333_s3 + $0x4] sm:$0xf] %vm125_vm2, %v165_v14 }
 0x10b   :  { %138 = vrot.lane.b32.xlu1 %v165_v14, %s240_s0  ;;  %130 = vrot.lane.b32.xlu0 %v165_v14, %s244_s23 }
 0x179   :  { %v137_v15 = vpop.permute.xlu1 %136  ;;  %v129_v16 = vpop.permute.xlu0 %128 }
 0x17a   :  { %142 = vst.msk [vmem:[%s335_s5] sm:$0xf] %vm125_vm2, %v137_v15  ;;  %134 = vst.msk [vmem:[%s334_s4] sm:$0xf] %vm125_vm2, %v129_v16 }
 0x17d   :  { %v139_v17 = vpop.permute.xlu1 %138  ;;  %v131_v18 = vpop.permute.xlu0 %130 }
 0x17e   :  { %143 = vst.msk [vmem:[%s335_s5 + $0x4] sm:$0xf] %vm125_vm2, %v139_v17  ;;  %135 = vst.msk [vmem:[%s334_s4 + $0x4] sm:$0xf] %vm125_vm2, %v131_v18 }
 0x17f   :  { %156 = vsyncpa [#allocation3], 1 }
 0x180   :  { %157 = vsyncpa [#allocation5], 1 }

// kernel: bert_self_attention_forward.3
= control target key start
LH: loop header
LB: loop body
LE: loop exit
PB: predicated region body
PF: predicated region fallthrough
CT: control target
= control target key end

     0   :  { %11 = vsyncpa [#allocation3], 0  ;;  %s1612_s0 = inlined_call_operand.vmem [shape: bf16[2,8,32], index: 0, kind: input, shape index: {}]   ;;  %s1613_s1 = inlined_call_operand.vmem [shape: bf16[2,8,32], index: 1, kind: input, shape index: {}]   ;;  %s1614_s2 = inlined_call_operand.vmem [shape: bf16[2,8,32], index: 2, kind: input, shape index: {}]   ;;  %s1615_s3 = inlined_call_operand.vmem [shape: f32[2,1,8], index: 3, kind: input, shape index: {}]   ;;  %s1616_s4 = inlined_call_operand.hbm [shape: f32[2,8,32], index: 4, kind: output, shape index: {0}]   ;;  %s1617_s5 = inlined_call_operand.hbm [shape: f32[2,4,8,8], index: 5, kind: output, shape index: {1}]  }
   0x1   :  { %13 = vsyncpa [#allocation3 + $0x1], 0 }
   0x2   :  { %14 = vsyncpa [#allocation5], 0 }
   0x3   :  { %16 = vsyncpa [#allocation5 + $0x1], 0  ;;  %s1364_s18 = smov 0   ;;  %s1366_s19 = smov 0  }
   0x4   :  { %s1368_s20 = smov 0   ;;  %s1370_s21 = smov 0  }
   0x5   :  { %s1372_s22 = smov 0   ;;  %s1374_s23 = smov 0  }
   0x6 LB: > { %s1026_s24 = sadd.s32 4294967295, %s1321_s23   ;;  %s1027_s25 = sadd.s32 4294967294, %s1321_s23   ;;  %s1321_s23 = sphi %s1374_s23, %s22_s23   ;;  %s1317_s22 = sphi %s1372_s22, %s1624_s22   ;;  %s1313_s21 = sphi %s1370_s21, %s1623_s21   ;;  %s1309_s20 = sphi %s1368_s20, %s1622_s20   ;;  %s1305_s19 = sphi %s1366_s19, %s1621_s19   ;;  %s1301_s18 = sphi %s1364_s18, %s1620_s18  }
   0x7   : > { %s41_s26 = sadd.s32 1, %s1317_s22  ;;  %s164_s27 = sadd.s32 1, %s1309_s20 }
   0x8   : > { %p43_p0 = scmp.ge.s32.totalorder %s41_s26, 2  ;;  %p174_p1 = scmp.ne.s32.totalorder %s1309_s20, %s1305_s19 }
   0x9   : > { %p175_p2 = scmp.eq.s32.totalorder %s1026_s24, 1  ;;  %p180_p3 = scmp.ne.s32.totalorder %s1305_s19, %s1301_s18 }
   0xa   : > { %s1626_s26 = smov (%p43_p0, %s41_s26), 0  ;;  %p181_p5 = scmp.eq.s32.totalorder %s1027_s25, 1 }
   0xb   : > { %p1404_p4 = por %p175_p2, %p174_p1  ;;  %s157_s29 = ssub.s32 %s1317_s22, %s1626_s26 }
   0xc   : > { %p1030_p6 = scmp.ge.s32.totalorder %s1321_s23, 1  ;;  %p162_p7 = scmp.eq.s32.totalorder %s157_s29, 0 }
   0xd   : > { %p1411_p8 = por %p181_p5, %p180_p3  ;;  %p268_p9 = scmp.lt.s32.totalorder %s1321_s23, 3 }
   0xe   : > { %s1417_s6 = scalar_select %p162_p7, %s1309_s20, %s164_s27  }
   0xf   : > { %p269_p10 = pnand %p1030_p6, %p268_p9 }
  0x10   : > { %p323_p11 = scmp.lt.s32.totalorder (!%p269_p10), %s1313_s21, 1  ;;  %v1323_v0 = vmov (!%p269_p10), 0.0   ;;  %vm1324_vm0 = vmmov (!%p269_p10), 0   ;;  %vm362_vm1 = vcmask (!%p269_p10), 64512   ;;  %s1325_s24 = smov (!%p269_p10), 120   ;;  %vm425_vm2 = vcmask (!%p269_p10), 1043456  }
  0x11   : > { %272 = sbr.rel (%p269_p10) target bundleno = 1500 (0x5dc), region = 36  ;;  %1075 = vmatprep.subr.bf16.mxu0 (!%p269_p10), %v1323_v0  ;;  %1077 = vmatprep.mubr.msk.bf16.mxu0 (!%p269_p10), %vm1324_vm0, %v1323_v0  ;;  %s1326_s25 = smov (!%p269_p10), 112  }
  0x12   : > { %1081 = vmatprep.subr.bf16.mxu1 (!%p269_p10), %v1323_v0  ;;  %1083 = vmatprep.mubr.msk.bf16.mxu1 (!%p269_p10), %vm1324_vm0, %v1323_v0  ;;  %s1327_s27 = smov (!%p269_p10), 104   ;;  %s1466_s10 = sand.u32 (!%p269_p10), 1, %s1305_s19  }
  0x13   : > { %s1328_s12 = smov (!%p269_p10), 8   ;;  %s1329_s13 = smov (!%p269_p10), 16  }
  0x14   : > { %s1058_s15 = sshll.u32 (!%p269_p10), %s1313_s21, 9  ;;  %s1330_s29 = smov (!%p269_p10), [#allocation4]  }
  0x18   : > { %s324_s7 = scalar_select %p323_p11, %s1313_s21, 1 }
  0x1a   : > { %s1427_s8 = sshll.u32 %s324_s7, 2  ;;  %s349_s17 = scalar_lea.vmem %s1615_s3, %s324_s7 }
  0x1b   : > { %s339_s11 = scalar_lea.vmem %s1613_s1, %s1427_s8  ;;  %s332_s14 = scalar_lea.vmem %s1612_s0, %s1427_s8  ;;  %v1445_v4 = vld [vmem:[%s349_s17] ss:$0 sm:$0xff] }
  0x1c   : > { %v354_v1 = vld [vmem:[%s339_s11] sm:$0xf]  ;;  %s346_s9 = scalar_lea.vmem %s1614_s2, %s1427_s8  ;;  %s1032_s11 = sshll.u32 %s1466_s10, 5 }
  0x1d   : > { %v367_v2 = vsel %vm362_vm1, %v354_v1, 0  ;;  %v353_v3 = vld [vmem:[%s332_s14] sm:$0xf]  ;;  %v1040_v11 = vcombine.low %v354_v1, %v354_v1  ;;  %s1470_s8 = scalar_lea.vmem [#allocation4], %s1032_s11  ;;  %s1215_s7 = sshll.u32 %s1330_s29, 4  ;;  %s1216_s7 = int_to_ptr.vmem [resolvable:$false] %s1215_s7 }
  0x1e   : > { %1076 = vmatpush3.bf16.xpose.msra.mxu0 %v367_v2  ;;  %v1039_v12 = vcombine.low %v353_v3, %v353_v3  ;;  %v1459_v18 = vld [vmem:[%s346_s9] sm:$0xf]  ;;  %s870_s14 = sshll.u32 %s1470_s8, 4  ;;  %s1217_s9 = scalar_lea.vmem %s1216_s7, 1024  ;;  %s1525_s14 = int_to_ptr.vmem [resolvable:$true] %s870_s14 }
  0x1f   : > { %1093 = vmatprep.subr.bf16.mxu0 %v1323_v0  ;;  %477 = vrot.lane.b32.xlu1 %v1040_v11, %s1325_s24  ;;  %v427_v19 = vsel %vm425_vm2, %v1459_v18, 0  ;;  %v1043_v2 = vcombine.low %v1459_v18, %v1459_v18  ;;  %p1218_p1 = scmp.lt.s32.totalorder %s1525_s14, %s1216_s7 }
  0x20   : > { %1082 = vmatpush3.bf16.msra.mxu1 %v427_v19 }
  0x21   : > { %1087 = vmatprep.subr.bf16.mxu1 %v1323_v0 }
  0x23   : > { %472 = vrot.lane.b32.xlu1 %v1039_v12, %s1325_s24 }
  0x25   : > { %1078 = vmatmul.mubr.msk.bf16.vlgmr.msra.gmra.mrb[0].mxu0 %vm362_vm1, %v353_v3 }
  0x26   : > { %1095 = vmatprep.mubr.msk.bf16.mxu0 %vm1324_vm0, %v1323_v0 }
  0x27   : > { %590 = vrot.lane.b32.xlu1 %v1039_v12, %s1326_s25 }
  0x2b   : > { %704 = vrot.lane.b32.xlu1 %v1040_v11, %s1327_s27 }
  0x2f   : > { %702 = vrot.lane.b32.xlu1 %v1039_v12, %s1327_s27 }
  0x91   : > { %v478_v22 = vpop.permute.xlu1 %477 }
  0x92   : > { %v483_v24 = vsel %vm362_vm1, %v478_v22, 0 }
  0x95   : > { %v473_v26 = vpop.permute.xlu1 %472 }
  0x99   : > { %v591_v28 = vpop.permute.xlu1 %590 }
  0x9d   : > { %v705_v30 = vpop.permute.xlu1 %704 }
  0x9e   : > { %v710_v31 = vsel %vm362_vm1, %v705_v30, 0 }
  0xa1   : > { %v703_v32 = vpop.permute.xlu1 %702 }
  0xf8   : > { %v403_v5 = vpop.f32.mrb[0].mxu0 }
  0xf9   : > { %v404_v6 = vadd.f32 %v1445_v4, %v403_v5  ;;  %v1079_v7 = vpop.f32.mrb[1].mxu0 }
  0xfa   : > { %v406_v8 = vpop.f32.mrb[2].mxu0 }
  0xfb   : > { %v1080_v9 = vpop.f32.mrb[3].mxu0  ;;  %v409_v10 = vsel %vm362_vm1, %v404_v6, -inf }
  0xfc   : > { %410 = vmax.xlane.f32.xlu0 %v409_v10 }
 0x189   : > { %v411_v13 = vpop.xlane.xlu0 %410 }
 0x18a   : > { %v412_v14 = vsub.f32 %v404_v6, %v411_v13 }
 0x18c   : > { %v413_v15 = vmul.f32 1.442695, %v412_v14 }
 0x18e   : > { %1195 = vpow2.f32 %v413_v15 }
 0x198   : > { %v1196_v16 = vpop.eup %1195 }
 0x199   : > { %v415_v17 = vsel %vm362_vm1, %v1196_v16, 0.0 }
 0x19a   : > { %416 = vadd.xlane.f32.xlu0 %v415_v17 }
 0x1b0   : > { %592 = vrot.lane.b32.xlu0 %v1040_v11, %s1326_s25 }
 0x227   : > { %v417_v20 = vpop.xlane.xlu0 %416 }
 0x228   : > { %1197 = vrcp.f32 %v417_v20 }
 0x22b   : > { %v593_v27 = vpop.permute.xlu0 %592 }
 0x22c   : > { %v598_v29 = vsel %vm362_vm1, %v593_v27, 0 }
 0x232   : > { %v1198_v21 = vpop.eup %1197 }
 0x233   : > { %v419_v23 = vmul.f32 %v1198_v21, %v1196_v16 }
 0x235   : > { %v421_v25 = vpack.c.bf16 %v419_v23, %v419_v23  ;;  %420 = vst.msk [vmem:[%s1470_s8] sm:$0xff] %vm362_vm1, %v419_v23 }
 0x237   : > { %1084 = vmatmul.mubr.msk.bf16.vlgmr.msra.gmra.mrb[0].mxu1 %vm362_vm1, %v421_v25 }
 0x238   : > { %1088 = vmatpush3.bf16.xpose.msra.mxu1 %v483_v24  ;;  %1089 = vmatprep.mubr.msk.bf16.mxu1 %vm1324_vm0, %v1323_v0 }
 0x239   : > { %1099 = vmatprep.subr.bf16.mxu1 %v1323_v0 }
 0x23f   : > { %1090 = vmatmul.mubr.msk.bf16.vlgmr.msra.gmra.mrb[4].mxu1 %vm362_vm1, %v473_v26 }
 0x240   : > { %1100 = vmatpush3.bf16.xpose.msra.mxu1 %v598_v29  ;;  %1101 = vmatprep.mubr.msk.bf16.mxu1 %vm1324_vm0, %v1323_v0 }
 0x241   : > { %1111 = vmatprep.subr.bf16.mxu1 %v1323_v0 }
 0x247   : > { %1102 = vmatmul.mubr.msk.bf16.vlgmr.msra.gmra.mrb[8].mxu1 %vm362_vm1, %v591_v28 }
 0x248   : > { %1112 = vmatpush3.bf16.xpose.msra.mxu1 %v710_v31  ;;  %1113 = vmatprep.mubr.msk.bf16.mxu1 %vm1324_vm0, %v1323_v0 }
 0x24f   : > { %1114 = vmatmul.mubr.msk.bf16.vlgmr.msra.gmra.mrb[12].mxu1 %vm362_vm1, %v703_v32 }
 0x30a   : > { %v1488_v33 = vpop.f32.mrb[0].mxu1 }
 0x30b   : > { %v1085_v34 = vpop.f32.mrb[1].mxu1 }
 0x30c   : > { %v466_v35 = vpop.f32.mrb[2].mxu1 }
 0x30d   : > { %v1086_v36 = vpop.f32.mrb[3].mxu1 }
 0x312   : > { %v519_v37 = vpop.f32.mrb[4].mxu1 }
 0x313   : > { %v520_v38 = vadd.f32 %v1445_v4, %v519_v37  ;;  %v1091_v39 = vpop.f32.mrb[5].mxu1 }
 0x314   : > { %v522_v40 = vpop.f32.mrb[6].mxu1 }
 0x315   : > { %v1092_v41 = vpop.f32.mrb[7].mxu1  ;;  %v525_v42 = vsel %vm362_vm1, %v520_v38, -inf }
 0x316   : > { %526 = vmax.xlane.f32.xlu1 %v525_v42 }
 0x31a   : > { %v634_v43 = vpop.f32.mrb[8].mxu1 }
 0x31b   : > { %v635_v44 = vadd.f32 %v1445_v4, %v634_v43  ;;  %v1103_v45 = vpop.f32.mrb[9].mxu1 }
 0x31c   : > { %v637_v46 = vpop.f32.mrb[10].mxu1 }
 0x31d   : > { %v640_v47 = vsel %vm362_vm1, %v635_v44, -inf  ;;  %v1104_v48 = vpop.f32.mrb[11].mxu1 }
 0x31e   : > { %641 = vmax.xlane.f32.xlu0 %v640_v47 }
 0x322   : > { %v746_v49 = vpop.f32.mrb[12].mxu1 }
 0x323   : > { %v747_v50 = vadd.f32 %v1445_v4, %v746_v49  ;;  %v1115_v51 = vpop.f32.mrb[13].mxu1 }
 0x324   : > { %v749_v52 = vpop.f32.mrb[14].mxu1 }
 0x325   : > { %v752_v53 = vsel %vm362_vm1, %v747_v50, -inf  ;;  %v1116_v54 = vpop.f32.mrb[15].mxu1 }
 0x326   : > { %753 = vmax.xlane.f32.xlu1 %v752_v53 }
 0x3a3   : > { %v527_v55 = vpop.xlane.xlu1 %526 }
 0x3a4   : > { %v528_v56 = vsub.f32 %v520_v38, %v527_v55 }
 0x3a6   : > { %v529_v57 = vmul.f32 1.442695, %v528_v56 }
 0x3a8   : > { %1199 = vpow2.f32 %v529_v57 }
 0x3ab   : > { %v642_v58 = vpop.xlane.xlu0 %641 }
 0x3ac   : > { %v643_v59 = vsub.f32 %v635_v44, %v642_v58 }
 0x3ae   : > { %v644_v60 = vmul.f32 1.442695, %v643_v59 }
 0x3b0   : > { %1201 = vpow2.f32 %v644_v60 }
 0x3b2   : > { %v1200_v61 = vpop.eup %1199 }
 0x3b3   : > { %v531_v62 = vsel %vm362_vm1, %v1200_v61, 0.0  ;;  %v754_v3 = vpop.xlane.xlu1 %753 }
 0x3b4   : > { %532 = vadd.xlane.f32.xlu1 %v531_v62  ;;  %v755_v4 = vsub.f32 %v747_v50, %v754_v3 }
 0x3b6   : > { %v756_v5 = vmul.f32 1.442695, %v755_v4 }
 0x3b8   : > { %1203 = vpow2.f32 %v756_v5 }
 0x3ba   : > { %v1202_v63 = vpop.eup %1201 }
 0x3bb   : > { %v646_v1 = vsel %vm362_vm1, %v1202_v63, 0.0 }
 0x3bc   : > { %647 = vadd.xlane.f32.xlu0 %v646_v1 }
 0x3c2   : > { %v1204_v6 = vpop.eup %1203 }
 0x3c3   : > { %v758_v7 = vsel %vm362_vm1, %v1204_v6, 0.0 }
 0x3c5   : > { %654 = vrot.lane.b32.xlu1 %v1043_v2, %s1326_s25  ;;  %s839_s25 = scalar_lea.sflag [#allocation5], %s1466_s10 }
 0x3d2   : > { %542 = vrot.lane.b32.xlu0 %v1043_v2, %s1325_s24  ;;  %s1530_s24 = scalar_lea.hbm %s1617_s5, %s1058_s15 }
 0x3e9   : > { %759 = vadd.xlane.f32.xlu1 %v758_v7 }
 0x3fa   : > { %766 = vrot.lane.b32.xlu1 %v1043_v2, %s1327_s27  ;;  %s1211_s27 = scalar_lea.vmem %s1525_s14, 512 }
 0x3fb   : > { %p1212_p12 = scmp.ne.s32.totalorder %s1525_s14, %s1211_s27  ;;  %p1219_p2 = scmp.lt.s32.totalorder %s1217_s9, %s1211_s27 }
 0x3fd   : > { %p1213_p13 = pnand %p1212_p12, %p1404_p4  ;;  %p1220_p3 = por %p1219_p2, %p1218_p1 }
 0x3ff   : > { %p1214_p0 = pneg %p1213_p13 }
 0x401   : > { %p1221_p5 = pnand %p1220_p3, %p1214_p0 }
 0x441   : > { %v533_v8 = vpop.xlane.xlu1 %532 }
 0x442   : > { %1205 = vrcp.f32 %v533_v8 }
 0x445   : > { %v655_v14 = vpop.permute.xlu1 %654 }
 0x446   : > { %v660_v16 = vsel %vm425_vm2, %v655_v14, 0 }
 0x449   : > { %v648_v9 = vpop.xlane.xlu0 %647 }
 0x44a   : > { %1207 = vrcp.f32 %v648_v9 }
 0x44c   : > { %v1206_v10 = vpop.eup %1205 }
 0x44d   : > { %v535_v11 = vmul.f32 %v1206_v10, %v1200_v61  ;;  %v543_v12 = vpop.permute.xlu0 %542 }
 0x44e   : > { %v548_v13 = vsel %vm425_vm2, %v543_v12, 0 }
 0x44f   : > { %1094 = vmatpush3.bf16.msra.mxu0 %v548_v13  ;;  %v538_v15 = vpack.c.bf16 %v535_v11, %v535_v11  ;;  %1042 = vst.msk [vmem:[%s1470_s8 + $0x8] sm:$0xff] %vm362_vm1, %v535_v11 }
 0x450   : > { %1105 = vmatprep.subr.bf16.mxu0 %v1323_v0 }
 0x452   : > { %1096 = vmatmul.mubr.msk.bf16.vlgmr.msra.gmra.mrb[4].mxu0 %vm362_vm1, %v538_v15 }
 0x453   : > { %1106 = vmatpush3.bf16.msra.mxu0 %v660_v16  ;;  %1107 = vmatprep.mubr.msk.bf16.mxu0 %vm1324_vm0, %v1323_v0 }
 0x454   : > { %v1208_v17 = vpop.eup %1207  ;;  %1117 = vmatprep.subr.bf16.mxu0 %v1323_v0 }
 0x455   : > { %v650_v18 = vmul.f32 %v1208_v17, %v1202_v63 }
 0x457   : > { %v653_v19 = vpack.c.bf16 %v650_v18, %v650_v18  ;;  %1046 = vst.msk [vmem:[%s1470_s8 + $0x10] sm:$0xff] %vm362_vm1, %v650_v18 }
 0x45a   : > { %1108 = vmatmul.mubr.msk.bf16.vlgmr.msra.gmra.mrb[8].mxu0 %vm362_vm1, %v653_v19 }
 0x45b   : > { %1119 = vmatprep.mubr.msk.bf16.mxu0 %vm1324_vm0, %v1323_v0 }
 0x476   : > { %v760_v20 = vpop.xlane.xlu1 %759 }
 0x477   : > { %1209 = vrcp.f32 %v760_v20 }
 0x47a   : > { %v767_v21 = vpop.permute.xlu1 %766 }
 0x47b   : > { %v772_v22 = vsel %vm425_vm2, %v767_v21, 0 }
 0x47c   : > { %1118 = vmatpush3.bf16.msra.mxu0 %v772_v22 }
 0x481   : > { %v1210_v23 = vpop.eup %1209 }
 0x482   : > { %v762_v24 = vmul.f32 %v1210_v23, %v1204_v6 }
 0x484   : > { %v765_v25 = vpack.c.bf16 %v762_v24, %v762_v24  ;;  %1049 = vst.msk [vmem:[%s1470_s8 + $0x18] sm:$0xff] %vm362_vm1, %v762_v24 }
 0x486   : > { %1120 = vmatmul.mubr.msk.bf16.vlgmr.msra.gmra.mrb[12].mxu0 %vm362_vm1, %v765_v25 }
 0x525   : > { %v584_v26 = vpop.f32.mrb[4].mxu0 }
 0x526   : > { %815 = vrot.lane.b32.xlu0 %v584_v26, %s1328_s12  ;;  %v1097_v0 = vpop.f32.mrb[5].mxu0 }
 0x527   : > { %v587_v27 = vpop.f32.mrb[6].mxu0 }
 0x528   : > { %v1098_v28 = vpop.f32.mrb[7].mxu0 }
 0x52d   : > { %v696_v29 = vpop.f32.mrb[8].mxu0 }
 0x52e   : > { %819 = vrot.lane.b32.xlu1 %v696_v29, %s1329_s13  ;;  %v1109_v30 = vpop.f32.mrb[9].mxu0 }
 0x52f   : > { %v699_v31 = vpop.f32.mrb[10].mxu0 }
 0x530   : > { %v1110_v32 = vpop.f32.mrb[11].mxu0 }
 0x531   : > { %1224 = shalt.err (!%p1221_p5)
}
 0x532   : > { %s1225_s11 = scalar_lea.hbm %s1530_s24, 512  ;;  %s1229_s15 = scalar_lea.hbm %s1617_s5, 1024 }
 0x533   : > { %p1226_p6 = scmp.ne.s32.totalorder %s1530_s24, %s1225_s11  ;;  %p1230_p10 = scmp.lt.u32.totalorder %s1530_s24, %s1617_s5 }
 0x534   : > { %p1231_p11 = scmp.lt.u32.totalorder %s1229_s15, %s1225_s11  ;;  %p1233_p13 = scmp.lt.u32.totalorder %s1225_s11, %s1530_s24 }
 0x535   : > { %p1227_p7 = pnand %p1226_p6, %p1404_p4 }
 0x536   : > { %p1232_p12 = por %p1231_p11, %p1230_p10 }
 0x537   : > { %p1228_p9 = pneg %p1227_p7 }
 0x538   : > { %p1234_p0 = por %p1233_p13, %p1232_p12 }
 0x53a   : > { %p1235_p1 = pnand %p1234_p0, %p1228_p9 }
 0x53c   : > { %1238 = shalt.err (!%p1235_p1)
}
 0x53d   : > { %s1331_s27 = smov 128   ;;  %s1332_s29 = smov 24   ;;  %vm827_vm3 = vcmask 130048   ;;  %vm829_vm4 = vcmask 195584   ;;  %vm831_vm5 = vcmask 261120  }
 0x53e   : > { %1124 = dma.vmem_to_hbm [thread:$0]  (%p1404_p4), %s1525_s14, 512, %s1530_s24, %s839_s25, %s1331_s27, %s1331_s27, %s1328_s12  }
 0x53f   : > { %s1031_s7 = sshll.u32 %s1466_s10, 3  ;;  %s1053_s9 = sshll.u32 %s1313_s21, 7 }
 0x540   : > { %s315_s11 = scalar_lea.vmem [#allocation2], %s1031_s7  ;;  %s1564_s24 = scalar_lea.hbm %s1616_s4, %s1053_s9 }
 0x541   : > { %s854_s8 = sshll.u32 %s315_s11, 4  ;;  %s834_s21 = scalar_lea.sflag [#allocation3], %s1466_s10  ;;  %s1566_s8 = int_to_ptr.vmem [resolvable:$true] %s854_s8 }
 0x542   : > { %s1239_s25 = scalar_lea.vmem %s1566_s8, 128  ;;  %s1333_s13 = smov [#allocation2]  }
 0x543   : > { %p1240_p2 = scmp.ne.s32.totalorder %s1566_s8, %s1239_s25  ;;  %s1243_s15 = sshll.u32 %s1333_s13, 4  ;;  %s1244_s15 = int_to_ptr.vmem [resolvable:$false] %s1243_s15 }
 0x544   : > { %s1245_s16 = scalar_lea.vmem %s1244_s15, 256  ;;  %p1246_p6 = scmp.lt.s32.totalorder %s1566_s8, %s1244_s15 }
 0x545   : > { %p1241_p3 = pnand %p1240_p2, %p1404_p4  ;;  %p1247_p7 = scmp.lt.s32.totalorder %s1245_s16, %s1239_s25 }
 0x547   : > { %p1242_p5 = pneg %p1241_p3  ;;  %p1248_p9 = por %p1247_p7, %p1246_p6 }
 0x549   : > { %p1249_p10 = pnand %p1248_p9, %p1242_p5 }
 0x559   : > { %v808_v34 = vpop.f32.mrb[12].mxu0 }
 0x55a   : > { %823 = vrot.lane.b32.xlu0 %v808_v34, %s1332_s29  ;;  %v1121_v35 = vpop.f32.mrb[13].mxu0 }
 0x55b   : > { %v811_v36 = vpop.f32.mrb[14].mxu0 }
 0x55c   : > { %v1122_v37 = vpop.f32.mrb[15].mxu0 }
 0x598   : > { %v816_v38 = vpop.permute.xlu0 %815 }
 0x599   : > { %v826_v40 = vsel %vm362_vm1, %v1488_v33, %v816_v38 }
 0x5a0   : > { %v820_v39 = vpop.permute.xlu1 %819 }
 0x5a1   : > { %v828_v41 = vsel %vm827_vm3, %v826_v40, %v820_v39 }
 0x5cc   : > { %v824_v42 = vpop.permute.xlu0 %823 }
 0x5cd   : > { %v830_v43 = vsel %vm829_vm4, %v828_v41, %v824_v42 }
 0x5ce   : > { %832 = vst.msk [vmem:[%s315_s11] sm:$0xff] %vm831_vm5, %v830_v43 }
 0x5cf   : > { %1252 = shalt.err (!%p1249_p10)
}
 0x5d0   : > { %s1253_s10 = scalar_lea.hbm %s1564_s24, 128  ;;  %s1257_s29 = scalar_lea.hbm %s1616_s4, 256 }
 0x5d1   : > { %p1254_p11 = scmp.ne.s32.totalorder %s1564_s24, %s1253_s10  ;;  %p1258_p0 = scmp.lt.u32.totalorder %s1564_s24, %s1616_s4 }
 0x5d2   : > { %p1259_p1 = scmp.lt.u32.totalorder %s1257_s29, %s1253_s10  ;;  %p1261_p3 = scmp.lt.u32.totalorder %s1253_s10, %s1564_s24 }
 0x5d3   : > { %p1255_p12 = pnand %p1254_p11, %p1404_p4 }
 0x5d4   : > { %p1260_p2 = por %p1259_p1, %p1258_p0 }
 0x5d5   : > { %p1256_p13 = pneg %p1255_p12 }
 0x5d6   : > { %p1262_p5 = por %p1261_p3, %p1260_p2 }
 0x5d8   : > { %p1263_p6 = pnand %p1262_p5, %p1256_p13 }
 0x5da   : > { %1266 = shalt.err (!%p1263_p6)
}
 0x5db   : > { %1123 = dma.vmem_to_hbm [thread:$0]  (%p1404_p4), %s1566_s8, 128, %s1564_s24, %s834_s21  }
 0x5dc PF: > { %p1134_p7 = scmp.ge.s32.totalorder %s1321_s23, 2  ;;  %s885_s11 = sand.u32 1, %s1301_s18  }
 0x5dd   : > { %s886_s12 = scalar_lea.sflag [#allocation3], %s885_s11 }
 0x5de   : > { %p1128_p9 = pnand %p1134_p7, %p1411_p8 }
 0x5e0   : > { %1292 = dma.done.wait (!%p1128_p9), %s886_s12, 128  }
 0x5e1   : > { %1294 = vsyncadd (!%p1128_p9), %s886_s12, 4294967168  ;;  %s895_s14 = scalar_lea.sflag [#allocation5], %s885_s11 }
 0x5e2   : > { %1296 = dma.done.wait (!%p1128_p9), %s895_s14, 512  }
 0x5e3   : > { %1298 = vsyncadd (!%p1128_p9), %s895_s14, 4294966784  ;;  %s22_s23 = sadd.s32 1, %s1321_s23   ;;  %s1620_s18 = smov %s1305_s19 }
 0x5e4   : > { %p19_p10 = scmp.ge.s32.totalorder %s22_s23, 4   ;;  %s1621_s19 = smov %s1309_s20 }
 0x5e5   : > { %s1622_s20 = smov %s1417_s6  ;;  %s1623_s21 = smov %s1317_s22 }
 0x5e6   : > { %s1624_s22 = smov %s1626_s26  ;;  %21 = sbr.rel (!%p19_p10) target bundleno = 6 (0x6), region = 100 }
 0x5ed   :  { %900 = vsyncpa [#allocation3], 1 }
 0x5ee   :  { %902 = vsyncpa [#allocation3 + $0x1], 1 }
 0x5ef   :  { %903 = vsyncpa [#allocation5], 1 }
 0x5f0   :  { %905 = vsyncpa [#allocation5 + $0x1], 1 }

</bundles_post_ra>
